<compile_context>
chip_gen: v7x
topology: tpu7x:2x2x1
jax: 0.10.0
libtpu: 0.0.40
codegen_flags: <defaults>
</compile_context>

<pallas_src>
import jax
import jax.numpy as jnp
from jax import lax
from jax.experimental import pallas as pl
from jax.experimental.pallas import tpu as pltpu


def lstm_fc_kernel(x_ref, wih_ref, whh_ref, b_ref, wfc_ref, bfc_ref,
                   out_ref, gx_ref):
    """Whole forward (minus embedding gather) in one kernel invocation.

    x_ref  : (T, Bp, E)   time-major embedded inputs (batch padded to Bp)
    wih_ref: (E, 4H)      input-to-hidden weights (pre-transposed)
    whh_ref: (H, 4H)      hidden-to-hidden weights (pre-transposed)
    b_ref  : (1, 4H)      b_ih + b_hh
    wfc_ref: (H, C)       final linear weights (pre-transposed)
    bfc_ref: (1, C)       final linear bias
    out_ref: (Bp, C)      classifier logits
    gx_ref : (T, Bp, 4H)  VMEM scratch: precomputed input gates for all steps
    """
    T, Bp, E = x_ref.shape
    H4 = whh_ref.shape[1]
    H = H4 // 4

    # Hoisted loads: weights / bias stay in vregs for the whole kernel.
    wih = wih_ref[...]
    whh = whh_ref[...]
    b = b_ref[...]

    # Phase 1: input projection for all timesteps in one MXU pass.
    #   (T*Bp, E) @ (E, 4H) + b  ->  (T*Bp, 4H)
    x_flat = x_ref[...].reshape(T * Bp, E)
    gx = jnp.dot(x_flat, wih, preferred_element_type=jnp.float32) + b
    gx_ref[...] = gx.reshape(T, Bp, H4)

    # Phase 2: serial recurrence.  Per step: one (Bp,H)x(H,4H) matmul + gates.
    h0 = jnp.zeros((Bp, H), jnp.float32)
    c0 = jnp.zeros((Bp, H), jnp.float32)

    def step(t, carry):
        h, c = carry
        gates = gx_ref[t] + jnp.dot(h, whh, preferred_element_type=jnp.float32)
        # PyTorch LSTM gate order: i, f, g, o.
        # NOTE: with H=32 each gate is a 32-lane sub-slice of one 128-lane
        # vreg; cheap at this size.  For H a multiple of 128 the slices become
        # clean full-lane tiles.
        i_g = jax.nn.sigmoid(gates[:, 0 * H:1 * H])
        f_g = jax.nn.sigmoid(gates[:, 1 * H:2 * H])
        g_g = jnp.tanh(gates[:, 2 * H:3 * H])
        o_g = jax.nn.sigmoid(gates[:, 3 * H:4 * H])
        c_new = f_g * c + i_g * g_g
        h_new = o_g * jnp.tanh(c_new)
        return (h_new, c_new)

    h_last, _ = lax.fori_loop(0, T, step, (h0, c0), unroll=True)

    # Final classifier head on the last hidden state (written once; C=4 is a
    # masked store but negligible since it happens a single time per call).
    out_ref[...] = (
        jnp.dot(h_last, wfc_ref[...], preferred_element_type=jnp.float32)
        + bfc_ref[...]
    )


def text_classifier_forward(input_idxs, params):
    """Pallas equivalent of TextClassifier.forward."""
    emb_table = params["embedding"]              # (V, E)
    w_ih = params["w_ih"]                        # (4H, E)  (PyTorch layout)
    w_hh = params["w_hh"]                        # (4H, H)
    b_ih = params["b_ih"]                        # (4H,)
    b_hh = params["b_hh"]                        # (4H,)
    w_fc = params["w_fc"]                        # (C, H)
    b_fc = params["b_fc"]                        # (C,)

    B, T = input_idxs.shape
    E = emb_table.shape[1]
    H = w_hh.shape[1]
    C = w_fc.shape[0]

    # Pad batch to the 8-row sublane granularity so vregs / MXU rows are filled.
    Bp = max(8, ((B + 7) // 8) * 8)

    # Glue: embedding gather (plain JAX), time-major layout, batch padding,
    # weight pre-transposition.
    # TODO(synk): fuse the embedding gather into the kernel (scalar-prefetched
    # token ids + DMA row gather) for production vocab/embedding sizes.
    x = emb_table[input_idxs]                    # (B, T, E)
    x = jnp.swapaxes(x, 0, 1)                    # (T, B, E) time-major
    x = jnp.pad(x, ((0, 0), (0, Bp - B), (0, 0)))

    wih_t = w_ih.T                               # (E, 4H)
    whh_t = w_hh.T                               # (H, 4H)
    b = (b_ih + b_hh).reshape(1, 4 * H)          # (1, 4H)
    wfc_t = w_fc.T                               # (H, C)
    bfc = b_fc.reshape(1, C)                     # (1, C)

    out = pl.pallas_call(
        lstm_fc_kernel,
        out_shape=jax.ShapeDtypeStruct((Bp, C), jnp.float32),
        grid=(1,),
        in_specs=[
            pl.BlockSpec((T, Bp, E), lambda i: (0, 0, 0)),   # x (time-major)
            pl.BlockSpec((E, 4 * H), lambda i: (0, 0)),      # W_ih^T
            pl.BlockSpec((H, 4 * H), lambda i: (0, 0)),      # W_hh^T
            pl.BlockSpec((1, 4 * H), lambda i: (0, 0)),      # bias
            pl.BlockSpec((H, C), lambda i: (0, 0)),          # W_fc^T
            pl.BlockSpec((1, C), lambda i: (0, 0)),          # b_fc
        ],
        out_specs=pl.BlockSpec((Bp, C), lambda i: (0, 0)),
        scratch_shapes=[
            pltpu.VMEM((T, Bp, 4 * H), jnp.float32),         # input gates
        ],
        compiler_params=pltpu.CompilerParams(
            dimension_semantics=("arbitrary",),
        ),
    )(x, wih_t, whh_t, b, wfc_t, bfc)
    return out[:B]


def text_classifier_reference(input_idxs, params):
    """Pure-JAX reference matching PyTorch LSTM semantics."""
    emb = params["embedding"][input_idxs]        # (B, T, E)
    B, T, E = emb.shape
    H = params["w_hh"].shape[1]
    wih_t = params["w_ih"].T
    whh_t = params["w_hh"].T
    b = params["b_ih"] + params["b_hh"]

    def step(carry, x_t):
        h, c = carry
        gates = x_t @ wih_t + h @ whh_t + b
        i = jax.nn.sigmoid(gates[:, 0 * H:1 * H])
        f = jax.nn.sigmoid(gates[:, 1 * H:2 * H])
        g = jnp.tanh(gates[:, 2 * H:3 * H])
        o = jax.nn.sigmoid(gates[:, 3 * H:4 * H])
        c_new = f * c + i * g
        h_new = o * jnp.tanh(c_new)
        return (h_new, c_new), None

    h0 = jnp.zeros((B, H), jnp.float32)
    c0 = jnp.zeros((B, H), jnp.float32)
    (h_last, _), _ = jax.lax.scan(step, (h0, c0), jnp.swapaxes(emb, 0, 1))
    return h_last @ params["w_fc"].T + params["b_fc"]


if __name__ == "__main__":
    # Small shapes consistent with the module's forward.
    VOCAB = 50
    EMBED = 32
    HIDDEN = 32
    CLASSES = 4
    B, T = 2, 8

    key = jax.random.PRNGKey(0)
    ks = jax.random.split(key, 8)
    scale = 0.1
    params = {
        "embedding": scale * jax.random.normal(ks[0], (VOCAB, EMBED), jnp.float32),
        "w_ih": scale * jax.random.normal(ks[1], (4 * HIDDEN, EMBED), jnp.float32),
        "w_hh": scale * jax.random.normal(ks[2], (4 * HIDDEN, HIDDEN), jnp.float32),
        "b_ih": scale * jax.random.normal(ks[3], (4 * HIDDEN,), jnp.float32),
        "b_hh": scale * jax.random.normal(ks[4], (4 * HIDDEN,), jnp.float32),
        "w_fc": scale * jax.random.normal(ks[5], (CLASSES, HIDDEN), jnp.float32),
        "b_fc": scale * jax.random.normal(ks[6], (CLASSES,), jnp.float32),
    }
    input_idxs = jax.random.randint(ks[7], (B, T), 0, VOCAB, dtype=jnp.int32)

    out = text_classifier_forward(input_idxs, params)
    out = jax.block_until_ready(out)

    ref = jax.block_until_ready(text_classifier_reference(input_idxs, params))
    assert out.shape == (B, CLASSES)
    assert jnp.allclose(out, ref, atol=1e-4, rtol=1e-4), (out, ref)

    print("KERNEL_OK")
</pallas_src>

<mosaic_0001>
module attributes {stable_mosaic.version = 11 : i64} {
  func.func @lstm_fc_kernel(%arg0: i32, %arg1: memref<8x8x32xf32, #tpu.memory_space<vmem>>, %arg2: memref<32x128xf32, #tpu.memory_space<vmem>>, %arg3: memref<32x128xf32, #tpu.memory_space<vmem>>, %arg4: memref<1x128xf32, #tpu.memory_space<vmem>>, %arg5: memref<32x4xf32, #tpu.memory_space<vmem>>, %arg6: memref<1x4xf32, #tpu.memory_space<vmem>>, %arg7: memref<8x4xf32, #tpu.memory_space<vmem>>, %arg8: memref<8x8x128xf32, #tpu.memory_space<vmem>>) attributes {dimension_semantics = [#tpu.dimension_semantics<arbitrary>], iteration_bounds = array<i64: 1>, scalar_prefetch = 0 : i64, scratch_operands = 1 : i64, tpu.core_type = #tpu.core_type<tc>, window_params = [{pipeline_mode = #tpu.pipeline_mode<synchronous>, transform_indices = @transform_0, window_bounds = array<i64: 8, 8, 32>}, {pipeline_mode = #tpu.pipeline_mode<synchronous>, transform_indices = @transform_1, window_bounds = array<i64: 32, 128>}, {pipeline_mode = #tpu.pipeline_mode<synchronous>, transform_indices = @transform_2, window_bounds = array<i64: 32, 128>}, {pipeline_mode = #tpu.pipeline_mode<synchronous>, transform_indices = @transform_3, window_bounds = array<i64: 1, 128>}, {pipeline_mode = #tpu.pipeline_mode<synchronous>, transform_indices = @transform_4, window_bounds = array<i64: 32, 4>}, {pipeline_mode = #tpu.pipeline_mode<synchronous>, transform_indices = @transform_5, window_bounds = array<i64: 1, 4>}, {pipeline_mode = #tpu.pipeline_mode<synchronous>, transform_indices = @transform_6, window_bounds = array<i64: 8, 4>}]} {
    %c0 = arith.constant 0 : index
    %c0_0 = arith.constant 0 : index
    %0 = vector.load %arg2[%c0, %c0_0] : memref<32x128xf32, #tpu.memory_space<vmem>>, vector<32x128xf32>
    %c0_1 = arith.constant 0 : index
    %c0_2 = arith.constant 0 : index
    %1 = vector.load %arg3[%c0_1, %c0_2] : memref<32x128xf32, #tpu.memory_space<vmem>>, vector<32x128xf32>
    %c0_3 = arith.constant 0 : index
    %c0_4 = arith.constant 0 : index
    %2 = vector.load %arg4[%c0_3, %c0_4] : memref<1x128xf32, #tpu.memory_space<vmem>>, vector<1x128xf32>
    %c0_5 = arith.constant 0 : index
    %c0_6 = arith.constant 0 : index
    %c0_7 = arith.constant 0 : index
    %3 = vector.load %arg1[%c0_5, %c0_6, %c0_7] : memref<8x8x32xf32, #tpu.memory_space<vmem>>, vector<8x8x32xf32>
    %4 = vector.shape_cast %3 : vector<8x8x32xf32> to vector<64x32xf32>
    %cst = arith.constant dense<0.000000e+00> : vector<64x128xf32>
    %5 = tpu.matmul %4, %0, %cst {dimension_numbers = #tpu.dot_dimension_numbers<[1], [0], [0], [1], [0, 0, 1, 1], [], []>} : vector<64x32xf32>, vector<32x128xf32>, vector<64x128xf32> -> vector<64x128xf32>
    %6 = vector.broadcast %2 : vector<1x128xf32> to vector<64x128xf32>
    %7 = arith.addf %5, %6 : vector<64x128xf32>
    %8 = vector.shape_cast %7 : vector<64x128xf32> to vector<8x8x128xf32>
    %c0_8 = arith.constant 0 : index
    %c0_9 = arith.constant 0 : index
    %c0_10 = arith.constant 0 : index
    %9 = vector.load %arg8[%c0_8, %c0_9, %c0_10] : memref<8x8x128xf32, #tpu.memory_space<vmem>>, vector<8x8x128xf32>
    tpu.vector_store %arg8[%c0_8, %c0_9, %c0_10], %8 {strides = array<i32>} : memref<8x8x128xf32, #tpu.memory_space<vmem>>, vector<8x8x128xf32>,
    %cst_11 = arith.constant 0.000000e+00 : f32
    %10 = vector.broadcast %cst_11 : f32 to vector<8x32xf32>
    %cst_12 = arith.constant 0.000000e+00 : f32
    %11 = vector.broadcast %cst_12 : f32 to vector<8x32xf32>
    %c0_i32 = arith.constant 0 : i32
    %12 = arith.index_cast %c0_i32 : i32 to index
    %c0_13 = arith.constant 0 : index
    %c0_14 = arith.constant 0 : index
    %13 = vector.load %arg8[%12, %c0_13, %c0_14] : memref<8x8x128xf32, #tpu.memory_space<vmem>>, vector<1x8x128xf32>
    %14 = vector.shape_cast %13 : vector<1x8x128xf32> to vector<8x128xf32>
    %cst_15 = arith.constant dense<0.000000e+00> : vector<8x128xf32>
    %15 = tpu.matmul %10, %1, %cst_15 {dimension_numbers = #tpu.dot_dimension_numbers<[1], [0], [0], [1], [0, 0, 1, 1], [], []>} : vector<8x32xf32>, vector<32x128xf32>, vector<8x128xf32> -> vector<8x128xf32>
    %16 = arith.addf %14, %15 : vector<8x128xf32>
    %17 = vector.extract_strided_slice %16 {offsets = [0, 0], sizes = [8, 32], strides = [1, 1]} : vector<8x128xf32> to vector<8x32xf32>
    %18 = arith.negf %17 : vector<8x32xf32>
    %19 = math.exp %18 : vector<8x32xf32>
    %cst_16 = arith.constant 1.000000e+00 : f32
    %20 = vector.broadcast %cst_16 : f32 to vector<8x32xf32>
    %21 = arith.addf %20, %19 : vector<8x32xf32>
    %22 = arith.divf %20, %21 : vector<8x32xf32>
    %23 = vector.extract_strided_slice %16 {offsets = [0, 32], sizes = [8, 32], strides = [1, 1]} : vector<8x128xf32> to vector<8x32xf32>
    %24 = arith.negf %23 : vector<8x32xf32>
    %25 = math.exp %24 : vector<8x32xf32>
    %cst_17 = arith.constant 1.000000e+00 : f32
    %26 = vector.broadcast %cst_17 : f32 to vector<8x32xf32>
    %27 = arith.addf %26, %25 : vector<8x32xf32>
    %28 = arith.divf %26, %27 : vector<8x32xf32>
    %29 = vector.extract_strided_slice %16 {offsets = [0, 64], sizes = [8, 32], strides = [1, 1]} : vector<8x128xf32> to vector<8x32xf32>
    %30 = math.tanh %29 : vector<8x32xf32>
    %31 = vector.extract_strided_slice %16 {offsets = [0, 96], sizes = [8, 32], strides = [1, 1]} : vector<8x128xf32> to vector<8x32xf32>
    %32 = arith.negf %31 : vector<8x32xf32>
    %33 = math.exp %32 : vector<8x32xf32>
    %cst_18 = arith.constant 1.000000e+00 : f32
    %34 = vector.broadcast %cst_18 : f32 to vector<8x32xf32>
    %35 = arith.addf %34, %33 : vector<8x32xf32>
    %36 = arith.divf %34, %35 : vector<8x32xf32>
    %37 = arith.mulf %28, %11 : vector<8x32xf32>
    %38 = arith.mulf %22, %30 : vector<8x32xf32>
    %39 = arith.addf %37, %38 : vector<8x32xf32>
    %40 = math.tanh %39 : vector<8x32xf32>
    %41 = arith.mulf %36, %40 : vector<8x32xf32>
    %c1_i32 = arith.constant 1 : i32
    %42 = arith.index_cast %c1_i32 : i32 to index
    %c0_19 = arith.constant 0 : index
    %c0_20 = arith.constant 0 : index
    %43 = vector.load %arg8[%42, %c0_19, %c0_20] : memref<8x8x128xf32, #tpu.memory_space<vmem>>, vector<1x8x128xf32>
    %44 = vector.shape_cast %43 : vector<1x8x128xf32> to vector<8x128xf32>
    %cst_21 = arith.constant dense<0.000000e+00> : vector<8x128xf32>
    %45 = tpu.matmul %41, %1, %cst_21 {dimension_numbers = #tpu.dot_dimension_numbers<[1], [0], [0], [1], [0, 0, 1, 1], [], []>} : vector<8x32xf32>, vector<32x128xf32>, vector<8x128xf32> -> vector<8x128xf32>
    %46 = arith.addf %44, %45 : vector<8x128xf32>
    %47 = vector.extract_strided_slice %46 {offsets = [0, 0], sizes = [8, 32], strides = [1, 1]} : vector<8x128xf32> to vector<8x32xf32>
    %48 = arith.negf %47 : vector<8x32xf32>
    %49 = math.exp %48 : vector<8x32xf32>
    %cst_22 = arith.constant 1.000000e+00 : f32
    %50 = vector.broadcast %cst_22 : f32 to vector<8x32xf32>
    %51 = arith.addf %50, %49 : vector<8x32xf32>
    %52 = arith.divf %50, %51 : vector<8x32xf32>
    %53 = vector.extract_strided_slice %46 {offsets = [0, 32], sizes = [8, 32], strides = [1, 1]} : vector<8x128xf32> to vector<8x32xf32>
    %54 = arith.negf %53 : vector<8x32xf32>
    %55 = math.exp %54 : vector<8x32xf32>
    %cst_23 = arith.constant 1.000000e+00 : f32
    %56 = vector.broadcast %cst_23 : f32 to vector<8x32xf32>
    %57 = arith.addf %56, %55 : vector<8x32xf32>
    %58 = arith.divf %56, %57 : vector<8x32xf32>
    %59 = vector.extract_strided_slice %46 {offsets = [0, 64], sizes = [8, 32], strides = [1, 1]} : vector<8x128xf32> to vector<8x32xf32>
    %60 = math.tanh %59 : vector<8x32xf32>
    %61 = vector.extract_strided_slice %46 {offsets = [0, 96], sizes = [8, 32], strides = [1, 1]} : vector<8x128xf32> to vector<8x32xf32>
    %62 = arith.negf %61 : vector<8x32xf32>
    %63 = math.exp %62 : vector<8x32xf32>
    %cst_24 = arith.constant 1.000000e+00 : f32
    %64 = vector.broadcast %cst_24 : f32 to vector<8x32xf32>
    %65 = arith.addf %64, %63 : vector<8x32xf32>
    %66 = arith.divf %64, %65 : vector<8x32xf32>
    %67 = arith.mulf %58, %39 : vector<8x32xf32>
    %68 = arith.mulf %52, %60 : vector<8x32xf32>
    %69 = arith.addf %67, %68 : vector<8x32xf32>
    %70 = math.tanh %69 : vector<8x32xf32>
    %71 = arith.mulf %66, %70 : vector<8x32xf32>
    %c2_i32 = arith.constant 2 : i32
    %72 = arith.index_cast %c2_i32 : i32 to index
    %c0_25 = arith.constant 0 : index
    %c0_26 = arith.constant 0 : index
    %73 = vector.load %arg8[%72, %c0_25, %c0_26] : memref<8x8x128xf32, #tpu.memory_space<vmem>>, vector<1x8x128xf32>
    %74 = vector.shape_cast %73 : vector<1x8x128xf32> to vector<8x128xf32>
    %cst_27 = arith.constant dense<0.000000e+00> : vector<8x128xf32>
    %75 = tpu.matmul %71, %1, %cst_27 {dimension_numbers = #tpu.dot_dimension_numbers<[1], [0], [0], [1], [0, 0, 1, 1], [], []>} : vector<8x32xf32>, vector<32x128xf32>, vector<8x128xf32> -> vector<8x128xf32>
    %76 = arith.addf %74, %75 : vector<8x128xf32>
    %77 = vector.extract_strided_slice %76 {offsets = [0, 0], sizes = [8, 32], strides = [1, 1]} : vector<8x128xf32> to vector<8x32xf32>
    %78 = arith.negf %77 : vector<8x32xf32>
    %79 = math.exp %78 : vector<8x32xf32>
    %cst_28 = arith.constant 1.000000e+00 : f32
    %80 = vector.broadcast %cst_28 : f32 to vector<8x32xf32>
    %81 = arith.addf %80, %79 : vector<8x32xf32>
    %82 = arith.divf %80, %81 : vector<8x32xf32>
    %83 = vector.extract_strided_slice %76 {offsets = [0, 32], sizes = [8, 32], strides = [1, 1]} : vector<8x128xf32> to vector<8x32xf32>
    %84 = arith.negf %83 : vector<8x32xf32>
    %85 = math.exp %84 : vector<8x32xf32>
    %cst_29 = arith.constant 1.000000e+00 : f32
    %86 = vector.broadcast %cst_29 : f32 to vector<8x32xf32>
    %87 = arith.addf %86, %85 : vector<8x32xf32>
    %88 = arith.divf %86, %87 : vector<8x32xf32>
    %89 = vector.extract_strided_slice %76 {offsets = [0, 64], sizes = [8, 32], strides = [1, 1]} : vector<8x128xf32> to vector<8x32xf32>
    %90 = math.tanh %89 : vector<8x32xf32>
    %91 = vector.extract_strided_slice %76 {offsets = [0, 96], sizes = [8, 32], strides = [1, 1]} : vector<8x128xf32> to vector<8x32xf32>
    %92 = arith.negf %91 : vector<8x32xf32>
    %93 = math.exp %92 : vector<8x32xf32>
    %cst_30 = arith.constant 1.000000e+00 : f32
    %94 = vector.broadcast %cst_30 : f32 to vector<8x32xf32>
    %95 = arith.addf %94, %93 : vector<8x32xf32>
    %96 = arith.divf %94, %95 : vector<8x32xf32>
    %97 = arith.mulf %88, %69 : vector<8x32xf32>
    %98 = arith.mulf %82, %90 : vector<8x32xf32>
    %99 = arith.addf %97, %98 : vector<8x32xf32>
    %100 = math.tanh %99 : vector<8x32xf32>
    %101 = arith.mulf %96, %100 : vector<8x32xf32>
    %c3_i32 = arith.constant 3 : i32
    %102 = arith.index_cast %c3_i32 : i32 to index
    %c0_31 = arith.constant 0 : index
    %c0_32 = arith.constant 0 : index
    %103 = vector.load %arg8[%102, %c0_31, %c0_32] : memref<8x8x128xf32, #tpu.memory_space<vmem>>, vector<1x8x128xf32>
    %104 = vector.shape_cast %103 : vector<1x8x128xf32> to vector<8x128xf32>
    %cst_33 = arith.constant dense<0.000000e+00> : vector<8x128xf32>
    %105 = tpu.matmul %101, %1, %cst_33 {dimension_numbers = #tpu.dot_dimension_numbers<[1], [0], [0], [1], [0, 0, 1, 1], [], []>} : vector<8x32xf32>, vector<32x128xf32>, vector<8x128xf32> -> vector<8x128xf32>
    %106 = arith.addf %104, %105 : vector<8x128xf32>
    %107 = vector.extract_strided_slice %106 {offsets = [0, 0], sizes = [8, 32], strides = [1, 1]} : vector<8x128xf32> to vector<8x32xf32>
    %108 = arith.negf %107 : vector<8x32xf32>
    %109 = math.exp %108 : vector<8x32xf32>
    %cst_34 = arith.constant 1.000000e+00 : f32
    %110 = vector.broadcast %cst_34 : f32 to vector<8x32xf32>
    %111 = arith.addf %110, %109 : vector<8x32xf32>
    %112 = arith.divf %110, %111 : vector<8x32xf32>
    %113 = vector.extract_strided_slice %106 {offsets = [0, 32], sizes = [8, 32], strides = [1, 1]} : vector<8x128xf32> to vector<8x32xf32>
    %114 = arith.negf %113 : vector<8x32xf32>
    %115 = math.exp %114 : vector<8x32xf32>
    %cst_35 = arith.constant 1.000000e+00 : f32
    %116 = vector.broadcast %cst_35 : f32 to vector<8x32xf32>
    %117 = arith.addf %116, %115 : vector<8x32xf32>
    %118 = arith.divf %116, %117 : vector<8x32xf32>
    %119 = vector.extract_strided_slice %106 {offsets = [0, 64], sizes = [8, 32], strides = [1, 1]} : vector<8x128xf32> to vector<8x32xf32>
    %120 = math.tanh %119 : vector<8x32xf32>
    %121 = vector.extract_strided_slice %106 {offsets = [0, 96], sizes = [8, 32], strides = [1, 1]} : vector<8x128xf32> to vector<8x32xf32>
    %122 = arith.negf %121 : vector<8x32xf32>
    %123 = math.exp %122 : vector<8x32xf32>
    %cst_36 = arith.constant 1.000000e+00 : f32
    %124 = vector.broadcast %cst_36 : f32 to vector<8x32xf32>
    %125 = arith.addf %124, %123 : vector<8x32xf32>
    %126 = arith.divf %124, %125 : vector<8x32xf32>
    %127 = arith.mulf %118, %99 : vector<8x32xf32>
    %128 = arith.mulf %112, %120 : vector<8x32xf32>
    %129 = arith.addf %127, %128 : vector<8x32xf32>
    %130 = math.tanh %129 : vector<8x32xf32>
    %131 = arith.mulf %126, %130 : vector<8x32xf32>
    %c4_i32 = arith.constant 4 : i32
    %132 = arith.index_cast %c4_i32 : i32 to index
    %c0_37 = arith.constant 0 : index
    %c0_38 = arith.constant 0 : index
    %133 = vector.load %arg8[%132, %c0_37, %c0_38] : memref<8x8x128xf32, #tpu.memory_space<vmem>>, vector<1x8x128xf32>
    %134 = vector.shape_cast %133 : vector<1x8x128xf32> to vector<8x128xf32>
    %cst_39 = arith.constant dense<0.000000e+00> : vector<8x128xf32>
    %135 = tpu.matmul %131, %1, %cst_39 {dimension_numbers = #tpu.dot_dimension_numbers<[1], [0], [0], [1], [0, 0, 1, 1], [], []>} : vector<8x32xf32>, vector<32x128xf32>, vector<8x128xf32> -> vector<8x128xf32>
    %136 = arith.addf %134, %135 : vector<8x128xf32>
    %137 = vector.extract_strided_slice %136 {offsets = [0, 0], sizes = [8, 32], strides = [1, 1]} : vector<8x128xf32> to vector<8x32xf32>
    %138 = arith.negf %137 : vector<8x32xf32>
    %139 = math.exp %138 : vector<8x32xf32>
    %cst_40 = arith.constant 1.000000e+00 : f32
    %140 = vector.broadcast %cst_40 : f32 to vector<8x32xf32>
    %141 = arith.addf %140, %139 : vector<8x32xf32>
    %142 = arith.divf %140, %141 : vector<8x32xf32>
    %143 = vector.extract_strided_slice %136 {offsets = [0, 32], sizes = [8, 32], strides = [1, 1]} : vector<8x128xf32> to vector<8x32xf32>
    %144 = arith.negf %143 : vector<8x32xf32>
    %145 = math.exp %144 : vector<8x32xf32>
    %cst_41 = arith.constant 1.000000e+00 : f32
    %146 = vector.broadcast %cst_41 : f32 to vector<8x32xf32>
    %147 = arith.addf %146, %145 : vector<8x32xf32>
    %148 = arith.divf %146, %147 : vector<8x32xf32>
    %149 = vector.extract_strided_slice %136 {offsets = [0, 64], sizes = [8, 32], strides = [1, 1]} : vector<8x128xf32> to vector<8x32xf32>
    %150 = math.tanh %149 : vector<8x32xf32>
    %151 = vector.extract_strided_slice %136 {offsets = [0, 96], sizes = [8, 32], strides = [1, 1]} : vector<8x128xf32> to vector<8x32xf32>
    %152 = arith.negf %151 : vector<8x32xf32>
    %153 = math.exp %152 : vector<8x32xf32>
    %cst_42 = arith.constant 1.000000e+00 : f32
    %154 = vector.broadcast %cst_42 : f32 to vector<8x32xf32>
    %155 = arith.addf %154, %153 : vector<8x32xf32>
    %156 = arith.divf %154, %155 : vector<8x32xf32>
    %157 = arith.mulf %148, %129 : vector<8x32xf32>
    %158 = arith.mulf %142, %150 : vector<8x32xf32>
    %159 = arith.addf %157, %158 : vector<8x32xf32>
    %160 = math.tanh %159 : vector<8x32xf32>
    %161 = arith.mulf %156, %160 : vector<8x32xf32>
    %c5_i32 = arith.constant 5 : i32
    %162 = arith.index_cast %c5_i32 : i32 to index
    %c0_43 = arith.constant 0 : index
    %c0_44 = arith.constant 0 : index
    %163 = vector.load %arg8[%162, %c0_43, %c0_44] : memref<8x8x128xf32, #tpu.memory_space<vmem>>, vector<1x8x128xf32>
    %164 = vector.shape_cast %163 : vector<1x8x128xf32> to vector<8x128xf32>
    %cst_45 = arith.constant dense<0.000000e+00> : vector<8x128xf32>
    %165 = tpu.matmul %161, %1, %cst_45 {dimension_numbers = #tpu.dot_dimension_numbers<[1], [0], [0], [1], [0, 0, 1, 1], [], []>} : vector<8x32xf32>, vector<32x128xf32>, vector<8x128xf32> -> vector<8x128xf32>
    %166 = arith.addf %164, %165 : vector<8x128xf32>
    %167 = vector.extract_strided_slice %166 {offsets = [0, 0], sizes = [8, 32], strides = [1, 1]} : vector<8x128xf32> to vector<8x32xf32>
    %168 = arith.negf %167 : vector<8x32xf32>
    %169 = math.exp %168 : vector<8x32xf32>
    %cst_46 = arith.constant 1.000000e+00 : f32
    %170 = vector.broadcast %cst_46 : f32 to vector<8x32xf32>
    %171 = arith.addf %170, %169 : vector<8x32xf32>
    %172 = arith.divf %170, %171 : vector<8x32xf32>
    %173 = vector.extract_strided_slice %166 {offsets = [0, 32], sizes = [8, 32], strides = [1, 1]} : vector<8x128xf32> to vector<8x32xf32>
    %174 = arith.negf %173 : vector<8x32xf32>
    %175 = math.exp %174 : vector<8x32xf32>
    %cst_47 = arith.constant 1.000000e+00 : f32
    %176 = vector.broadcast %cst_47 : f32 to vector<8x32xf32>
    %177 = arith.addf %176, %175 : vector<8x32xf32>
    %178 = arith.divf %176, %177 : vector<8x32xf32>
    %179 = vector.extract_strided_slice %166 {offsets = [0, 64], sizes = [8, 32], strides = [1, 1]} : vector<8x128xf32> to vector<8x32xf32>
    %180 = math.tanh %179 : vector<8x32xf32>
    %181 = vector.extract_strided_slice %166 {offsets = [0, 96], sizes = [8, 32], strides = [1, 1]} : vector<8x128xf32> to vector<8x32xf32>
    %182 = arith.negf %181 : vector<8x32xf32>
    %183 = math.exp %182 : vector<8x32xf32>
    %cst_48 = arith.constant 1.000000e+00 : f32
    %184 = vector.broadcast %cst_48 : f32 to vector<8x32xf32>
    %185 = arith.addf %184, %183 : vector<8x32xf32>
    %186 = arith.divf %184, %185 : vector<8x32xf32>
    %187 = arith.mulf %178, %159 : vector<8x32xf32>
    %188 = arith.mulf %172, %180 : vector<8x32xf32>
    %189 = arith.addf %187, %188 : vector<8x32xf32>
    %190 = math.tanh %189 : vector<8x32xf32>
    %191 = arith.mulf %186, %190 : vector<8x32xf32>
    %c6_i32 = arith.constant 6 : i32
    %192 = arith.index_cast %c6_i32 : i32 to index
    %c0_49 = arith.constant 0 : index
    %c0_50 = arith.constant 0 : index
    %193 = vector.load %arg8[%192, %c0_49, %c0_50] : memref<8x8x128xf32, #tpu.memory_space<vmem>>, vector<1x8x128xf32>
    %194 = vector.shape_cast %193 : vector<1x8x128xf32> to vector<8x128xf32>
    %cst_51 = arith.constant dense<0.000000e+00> : vector<8x128xf32>
    %195 = tpu.matmul %191, %1, %cst_51 {dimension_numbers = #tpu.dot_dimension_numbers<[1], [0], [0], [1], [0, 0, 1, 1], [], []>} : vector<8x32xf32>, vector<32x128xf32>, vector<8x128xf32> -> vector<8x128xf32>
    %196 = arith.addf %194, %195 : vector<8x128xf32>
    %197 = vector.extract_strided_slice %196 {offsets = [0, 0], sizes = [8, 32], strides = [1, 1]} : vector<8x128xf32> to vector<8x32xf32>
    %198 = arith.negf %197 : vector<8x32xf32>
    %199 = math.exp %198 : vector<8x32xf32>
    %cst_52 = arith.constant 1.000000e+00 : f32
    %200 = vector.broadcast %cst_52 : f32 to vector<8x32xf32>
    %201 = arith.addf %200, %199 : vector<8x32xf32>
    %202 = arith.divf %200, %201 : vector<8x32xf32>
    %203 = vector.extract_strided_slice %196 {offsets = [0, 32], sizes = [8, 32], strides = [1, 1]} : vector<8x128xf32> to vector<8x32xf32>
    %204 = arith.negf %203 : vector<8x32xf32>
    %205 = math.exp %204 : vector<8x32xf32>
    %cst_53 = arith.constant 1.000000e+00 : f32
    %206 = vector.broadcast %cst_53 : f32 to vector<8x32xf32>
    %207 = arith.addf %206, %205 : vector<8x32xf32>
    %208 = arith.divf %206, %207 : vector<8x32xf32>
    %209 = vector.extract_strided_slice %196 {offsets = [0, 64], sizes = [8, 32], strides = [1, 1]} : vector<8x128xf32> to vector<8x32xf32>
    %210 = math.tanh %209 : vector<8x32xf32>
    %211 = vector.extract_strided_slice %196 {offsets = [0, 96], sizes = [8, 32], strides = [1, 1]} : vector<8x128xf32> to vector<8x32xf32>
    %212 = arith.negf %211 : vector<8x32xf32>
    %213 = math.exp %212 : vector<8x32xf32>
    %cst_54 = arith.constant 1.000000e+00 : f32
    %214 = vector.broadcast %cst_54 : f32 to vector<8x32xf32>
    %215 = arith.addf %214, %213 : vector<8x32xf32>
    %216 = arith.divf %214, %215 : vector<8x32xf32>
    %217 = arith.mulf %208, %189 : vector<8x32xf32>
    %218 = arith.mulf %202, %210 : vector<8x32xf32>
    %219 = arith.addf %217, %218 : vector<8x32xf32>
    %220 = math.tanh %219 : vector<8x32xf32>
    %221 = arith.mulf %216, %220 : vector<8x32xf32>
    %c7_i32 = arith.constant 7 : i32
    %222 = arith.index_cast %c7_i32 : i32 to index
    %c0_55 = arith.constant 0 : index
    %c0_56 = arith.constant 0 : index
    %223 = vector.load %arg8[%222, %c0_55, %c0_56] : memref<8x8x128xf32, #tpu.memory_space<vmem>>, vector<1x8x128xf32>
    %224 = vector.shape_cast %223 : vector<1x8x128xf32> to vector<8x128xf32>
    %cst_57 = arith.constant dense<0.000000e+00> : vector<8x128xf32>
    %225 = tpu.matmul %221, %1, %cst_57 {dimension_numbers = #tpu.dot_dimension_numbers<[1], [0], [0], [1], [0, 0, 1, 1], [], []>} : vector<8x32xf32>, vector<32x128xf32>, vector<8x128xf32> -> vector<8x128xf32>
    %226 = arith.addf %224, %225 : vector<8x128xf32>
    %227 = vector.extract_strided_slice %226 {offsets = [0, 0], sizes = [8, 32], strides = [1, 1]} : vector<8x128xf32> to vector<8x32xf32>
    %228 = arith.negf %227 : vector<8x32xf32>
    %229 = math.exp %228 : vector<8x32xf32>
    %cst_58 = arith.constant 1.000000e+00 : f32
    %230 = vector.broadcast %cst_58 : f32 to vector<8x32xf32>
    %231 = arith.addf %230, %229 : vector<8x32xf32>
    %232 = arith.divf %230, %231 : vector<8x32xf32>
    %233 = vector.extract_strided_slice %226 {offsets = [0, 32], sizes = [8, 32], strides = [1, 1]} : vector<8x128xf32> to vector<8x32xf32>
    %234 = arith.negf %233 : vector<8x32xf32>
    %235 = math.exp %234 : vector<8x32xf32>
    %cst_59 = arith.constant 1.000000e+00 : f32
    %236 = vector.broadcast %cst_59 : f32 to vector<8x32xf32>
    %237 = arith.addf %236, %235 : vector<8x32xf32>
    %238 = arith.divf %236, %237 : vector<8x32xf32>
    %239 = vector.extract_strided_slice %226 {offsets = [0, 64], sizes = [8, 32], strides = [1, 1]} : vector<8x128xf32> to vector<8x32xf32>
    %240 = math.tanh %239 : vector<8x32xf32>
    %241 = vector.extract_strided_slice %226 {offsets = [0, 96], sizes = [8, 32], strides = [1, 1]} : vector<8x128xf32> to vector<8x32xf32>
    %242 = arith.negf %241 : vector<8x32xf32>
    %243 = math.exp %242 : vector<8x32xf32>
    %cst_60 = arith.constant 1.000000e+00 : f32
    %244 = vector.broadcast %cst_60 : f32 to vector<8x32xf32>
    %245 = arith.addf %244, %243 : vector<8x32xf32>
    %246 = arith.divf %244, %245 : vector<8x32xf32>
    %247 = arith.mulf %238, %219 : vector<8x32xf32>
    %248 = arith.mulf %232, %240 : vector<8x32xf32>
    %249 = arith.addf %247, %248 : vector<8x32xf32>
    %250 = math.tanh %249 : vector<8x32xf32>
    %251 = arith.mulf %246, %250 : vector<8x32xf32>
    %c8_i32 = arith.constant 8 : i32
    %c0_61 = arith.constant 0 : index
    %c0_62 = arith.constant 0 : index
    %252 = vector.load %arg5[%c0_61, %c0_62] : memref<32x4xf32, #tpu.memory_space<vmem>>, vector<32x4xf32>
    %cst_63 = arith.constant dense<0.000000e+00> : vector<8x4xf32>
    %253 = tpu.matmul %251, %252, %cst_63 {dimension_numbers = #tpu.dot_dimension_numbers<[1], [0], [0], [1], [0, 0, 1, 1], [], []>} : vector<8x32xf32>, vector<32x4xf32>, vector<8x4xf32> -> vector<8x4xf32>
    %c0_64 = arith.constant 0 : index
    %c0_65 = arith.constant 0 : index
    %254 = vector.load %arg6[%c0_64, %c0_65] : memref<1x4xf32, #tpu.memory_space<vmem>>, vector<1x4xf32>
    %255 = vector.broadcast %254 : vector<1x4xf32> to vector<8x4xf32>
    %256 = arith.addf %253, %255 : vector<8x4xf32>
    %c0_66 = arith.constant 0 : index
    %c0_67 = arith.constant 0 : index
    %257 = vector.load %arg7[%c0_66, %c0_67] : memref<8x4xf32, #tpu.memory_space<vmem>>, vector<8x4xf32>
    tpu.vector_store %arg7[%c0_66, %c0_67], %256 {strides = array<i32>} : memref<8x4xf32, #tpu.memory_space<vmem>>, vector<8x4xf32>,
    return
  }
  func.func @transform_0(%arg0: i32) -> (i32, i32, i32) {
    %c0_i32 = arith.constant 0 : i32
    %c0_i32_0 = arith.constant 0 : i32
    %c0_i32_1 = arith.constant 0 : i32
    %c0_i32_2 = arith.constant 0 : i32
    return %c0_i32, %c0_i32_0, %c0_i32_1 : i32, i32, i32
  }
  func.func @transform_1(%arg0: i32) -> (i32, i32) {
    %c0_i32 = arith.constant 0 : i32
    %c0_i32_0 = arith.constant 0 : i32
    %c0_i32_1 = arith.constant 0 : i32
    return %c0_i32, %c0_i32_0 : i32, i32
  }
  func.func @transform_2(%arg0: i32) -> (i32, i32) {
    %c0_i32 = arith.constant 0 : i32
    %c0_i32_0 = arith.constant 0 : i32
    %c0_i32_1 = arith.constant 0 : i32
    return %c0_i32, %c0_i32_0 : i32, i32
  }
  func.func @transform_3(%arg0: i32) -> (i32, i32) {
    %c0_i32 = arith.constant 0 : i32
    %c0_i32_0 = arith.constant 0 : i32
    %c0_i32_1 = arith.constant 0 : i32
    return %c0_i32, %c0_i32_0 : i32, i32
  }
  func.func @transform_4(%arg0: i32) -> (i32, i32) {
    %c0_i32 = arith.constant 0 : i32
    %c0_i32_0 = arith.constant 0 : i32
    %c0_i32_1 = arith.constant 0 : i32
    return %c0_i32, %c0_i32_0 : i32, i32
  }
  func.func @transform_5(%arg0: i32) -> (i32, i32) {
    %c0_i32 = arith.constant 0 : i32
    %c0_i32_0 = arith.constant 0 : i32
    %c0_i32_1 = arith.constant 0 : i32
    return %c0_i32, %c0_i32_0 : i32, i32
  }
  func.func @transform_6(%arg0: i32) -> (i32, i32) {
    %c0_i32 = arith.constant 0 : i32
    %c0_i32_0 = arith.constant 0 : i32
    %c0_i32_1 = arith.constant 0 : i32
    return %c0_i32, %c0_i32_0 : i32, i32
  }
}

</mosaic_0001>

<bundles_post_ra>
// kernel: tpu_custom_call.1
= control target key start
LH: loop header
LB: loop body
LE: loop exit
PB: predicated region body
PF: predicated region fallthrough
CT: control target
= control target key end

     0   :  { %11 = vsyncpa [#allocation4], 0  ;;  %s1732_s0 = inlined_call_operand.hbm [shape: f32[8,8,32], index: 0, kind: input, shape index: {}]   ;;  %s1733_s1 = inlined_call_operand.vmem [shape: f32[32,128], index: 1, kind: input, shape index: {}]   ;;  %s1734_s2 = inlined_call_operand.hbm [shape: f32[32,128], index: 2, kind: input, shape index: {}]   ;;  %s1735_s3 = inlined_call_operand.vmem [shape: f32[1,128], index: 3, kind: input, shape index: {}]   ;;  %s1736_s4 = inlined_call_operand.vmem [shape: f32[32,4], index: 4, kind: input, shape index: {}]   ;;  %s1737_s5 = inlined_call_operand.vmem [shape: f32[1,4], index: 5, kind: input, shape index: {}]   ;;  %s1738_s6 = inlined_call_operand.vmem [shape: f32[8,4], index: 6, kind: output, shape index: {}]  }
   0x1   :  { %12 = vsyncpa [#allocation6], 0  ;;  %s1504_s21 = smov [#allocation3]   ;;  %s1456_s25 = scalar_lea.hbm %s1732_s0, 1024 }
   0x2   :  { %s18_s22 = sshll.u32 %s1504_s21, 4  ;;  %p1457_p0 = scmp.ne.s32.totalorder %s1732_s0, %s1456_s25  ;;  %s19_s22 = int_to_ptr.vmem [resolvable:$true] %s18_s22 }
   0x3   :  { %p1460_p1 = scmp.lt.u32.totalorder %s1456_s25, %s1732_s0 }
   0x5   :  { %p1462_p2 = pnand %p1460_p1, %p1457_p0 }
   0x7   :  { %1465 = shalt.err (!%p1462_p2)
}
   0x8   :  { %s1466_s30 = scalar_lea.vmem %s19_s22, 1024  ;;  %p1471_p4 = scmp.lt.s32.totalorder %s19_s22, %s19_s22 }
   0x9   :  { %p1467_p3 = scmp.ne.s32.totalorder %s19_s22, %s1466_s30  ;;  %p1472_p5 = scmp.lt.s32.totalorder %s1466_s30, %s1466_s30 }
   0xb   :  { %p1473_p6 = por %p1472_p5, %p1471_p4 }
   0xd   :  { %p1474_p7 = pnand %p1473_p6, %p1467_p3 }
   0xf   :  { %1477 = shalt.err (!%p1474_p7)
}
  0x10   :  { %s1505_s7 = smov 128   ;;  %s1506_s8 = smov 8  }
  0x11   :  { %24 = dma.hbm_to_vmem [thread:$0]  %s1732_s0, 1024, %s19_s22, [#allocation4], %s1505_s7, %s1505_s7, %s1506_s8  }
  0x12   :  { %s1507_s11 = smov [#allocation5]   ;;  %s1478_s15 = scalar_lea.hbm %s1734_s2, 512 }
  0x13   :  { %s32_s12 = sshll.u32 %s1507_s11, 4  ;;  %p1479_p8 = scmp.ne.s32.totalorder %s1734_s2, %s1478_s15  ;;  %s33_s12 = int_to_ptr.vmem [resolvable:$true] %s32_s12 }
  0x14   :  { %p1482_p9 = scmp.lt.u32.totalorder %s1478_s15, %s1734_s2 }
  0x16   :  { %p1484_p10 = pnand %p1482_p9, %p1479_p8 }
  0x18   :  { %1487 = shalt.err (!%p1484_p10)
}
  0x19   :  { %s1488_s20 = scalar_lea.vmem %s33_s12, 512  ;;  %p1493_p12 = scmp.lt.s32.totalorder %s33_s12, %s33_s12 }
  0x1a   :  { %p1489_p11 = scmp.ne.s32.totalorder %s33_s12, %s1488_s20  ;;  %p1494_p13 = scmp.lt.s32.totalorder %s1488_s20, %s1488_s20 }
  0x1c   :  { %p1495_p0 = por %p1494_p13, %p1493_p12 }
  0x1e   :  { %p1496_p1 = pnand %p1495_p0, %p1489_p11 }
  0x20   :  { %1499 = shalt.err (!%p1496_p1)
}
  0x21   :  { %38 = dma.hbm_to_vmem [thread:$0]  %s1734_s2, 512, %s33_s12, [#allocation6], %s1505_s7, %s1505_s7, %s1506_s8  }
  0x22   :  { %1500 = dma.done.wait [#allocation4], 1024  }
  0x23   :  { %1501 = vsyncadd [#allocation4], 4294966272 }
  0x24   :  { %1502 = dma.done.wait [#allocation6], 512  }
  0x25   :  { %1503 = vsyncadd [#allocation6], 4294966784  ;;  %v1508_v0 = vmov 0.0|0.0   ;;  %vm1509_vm0 = vmmov 0   ;;  %v1510_v1 = vmov 0.0   ;;  %v51_v2 = vld [vmem:[%s1733_s1] sm:$0xff] }
  0x26   :  { %1329 = vmatprep.subr.bf16.mxu1 %v1508_v0  ;;  %1230 = vmatprep.mubr.msk.f32.mxu1 %vm1509_vm0, %v1510_v1  ;;  %v52_v3 = vld [vmem:[%s1733_s1 + $0x8] sm:$0xff]  ;;  %v55_v4 = vld [vmem:[#allocation5] sm:$0xff]  ;;  %vm74_vm1 = vcmask 261120   ;;  %v53_v7 = vld [vmem:[%s1733_s1 + $0x10] sm:$0xff]  ;;  %s1511_s30 = smov 64   ;;  %vm1111_vm2 = vcmask 31744  }
  0x27   :  { %v1321_v5 = vpack.c.bf16 %v52_v3, %v51_v2  ;;  %v56_v6 = vld [vmem:[#allocation5 + $0x8] sm:$0xff]  ;;  %v54_v8 = vld [vmem:[%s1733_s1 + $0x18] sm:$0xff]  ;;  %v60_v11 = vld [vmem:[#allocation3] sm:$0xff] }
  0x28   :  { %v1587_v9 = vpack.c.bf16 %v56_v6, %v55_v4  ;;  %v1325_v10 = vpack.c.bf16 %v54_v8, %v53_v7  ;;  %v57_v12 = vld [vmem:[#allocation5 + $0x10] sm:$0xff]  ;;  %v58_v13 = vld [vmem:[#allocation5 + $0x18] sm:$0xff]  ;;  %1210 = vmatprep.mubr.msk.f32.mxu0 %vm74_vm1, %v60_v11  ;;  %v61_v15 = vld [vmem:[#allocation3 + $0x8] sm:$0xff] }
  0x29   :  { %1322 = vmatprep.subr.bf16.mxu0 %v1321_v5  ;;  %v1591_v14 = vpack.c.bf16 %v58_v13, %v57_v12  ;;  %v1612_v16 = vld [vmem:[%s1735_s3] ss:$0 sm:$0xff]  ;;  %s1512_s3 = smov 32   ;;  %v62_v51 = vld [vmem:[#allocation3 + $0x10] sm:$0xff]  ;;  %v63_v52 = vld [vmem:[#allocation3 + $0x18] sm:$0xff] }
  0x2a   :  { %1324 = vmatpush3.bf16.msra.mxu0 %v1321_v5  ;;  %1331 = vmatpush3.bf16.msra.mxu1 %v1587_v9  ;;  %v64_v53 = vld [vmem:[#allocation3 + $0x20] sm:$0xff]  ;;  %v65_v54 = vld [vmem:[#allocation3 + $0x28] sm:$0xff]  ;;  %v66_v55 = vld [vmem:[#allocation3 + $0x30] sm:$0xff] }
  0x2b   :  { %1326 = vmatprep.subr.bf16.mxu0 %v1325_v10  ;;  %1332 = vmatprep.subr.bf16.mxu1 %v1508_v0  ;;  %v67_v56 = vld [vmem:[#allocation3 + $0x38] sm:$0xff] }
  0x2e   :  { %1328 = vmatpush3.bf16.msra.mxu0 %v1325_v10  ;;  %1334 = vmatpush3.bf16.msra.mxu1 %v1591_v14 }
  0x2f   :  { %1335 = vmatprep.subr.bf16.mxu1 %v1508_v0  ;;  %1341 = vmatprep.subr.bf16.mxu0 %v1508_v0 }
  0x31   :  { %1211 = vmatmul.mubr.msk.f32.vlgmr.msra.gmra.mrb[0].mxu0 %vm74_vm1, %v61_v15  ;;  %1231 = vmatmul.mubr.f32.vlgmr.msra.gmra.mrb[0].mxu1 %v1510_v1 }
  0x32   :  { %1337 = vmatpush3.bf16.msra.mxu1 %v1587_v9  ;;  %1241 = vmatprep.mubr.msk.f32.mxu1 %vm1509_vm0, %v1510_v1 }
  0x33   :  { %1338 = vmatprep.subr.bf16.mxu1 %v1508_v0  ;;  %1343 = vmatpush3.bf16.msra.mxu0 %v1587_v9 }
  0x34   :  { %1344 = vmatprep.subr.bf16.mxu0 %v1508_v0  ;;  %1213 = vmatprep.mubr.msk.f32.mxu0 %vm74_vm1, %v62_v51 }
  0x35   :  { %1214 = vmatmul.mubr.msk.f32.gmra.mrb[2].mxu0 %vm74_vm1, %v63_v52 }
  0x36   :  { %1340 = vmatpush3.bf16.msra.mxu1 %v1591_v14  ;;  %1216 = vmatprep.mubr.msk.f32.mxu0 %vm74_vm1, %v64_v53 }
  0x37   :  { %1346 = vmatpush3.bf16.msra.mxu0 %v1591_v14  ;;  %1347 = vmatprep.subr.bf16.mxu1 %v1508_v0 }
  0x38   :  { %1353 = vmatprep.subr.bf16.mxu0 %v1508_v0 }
  0x39   :  { %1217 = vmatmul.mubr.msk.f32.gmra.mrb[4].mxu0 %vm74_vm1, %v65_v54 }
  0x3a   :  { %1219 = vmatprep.mubr.msk.f32.mxu0 %vm74_vm1, %v66_v55 }
  0x3d   :  { %1220 = vmatmul.mubr.msk.f32.gmra.mrb[6].mxu0 %vm74_vm1, %v67_v56 }
  0x3e   :  { %1252 = vmatprep.mubr.msk.f32.mxu0 %vm1509_vm0, %v1510_v1 }
 0x104   :  { %v1212_v17 = vpop.f32.mrb[0].mxu0  ;;  %v282_v18 = vpop.f32.mrb[0].mxu1 }
 0x105   :  { %v165_v19 = vpop.f32.mrb[1].mxu0  ;;  %v1232_v20 = vpop.f32.mrb[1].mxu1  ;;  %v171_v37 = vadd.f32 %v1212_v17, %v1612_v16 }
 0x106   :  { %v166_v21 = vadd.f32 %v1612_v16, %v165_v19 }
 0x108   :  { %v286_v22 = vadd.f32 %v282_v18, %v166_v21  ;;  %v1215_v60 = vpop.f32.mrb[2].mxu0 }
 0x109   :  { %v175_v61 = vpop.f32.mrb[3].mxu0 }
 0x10a   :  { %1392 = vtanh.f32 %v286_v22  ;;  %v1128_v24 = vmul.f32 -1.442695, %v286_v22  ;;  %v176_v5 = vadd.f32 %v1612_v16, %v175_v61 }
 0x10c   :  { %1394 = vpow2.f32 %v1128_v24  ;;  %v1639_v62 = vpop.f32.mrb[4].mxu0 }
 0x10d   :  { %v1641_v63 = vpop.f32.mrb[5].mxu0 }
 0x110   :  { %v1643_v2 = vpop.f32.mrb[6].mxu0 }
 0x111   :  { %v1645_v3 = vpop.f32.mrb[7].mxu0 }
 0x114   :  { %v1393_v23 = vpop.eup %1392 }
 0x115   :  { %296 = vrot.lane.b32.xlu0 %v1393_v23, %s1511_s30 }
 0x116   :  { %v1395_v25 = vpop.eup %1394 }
 0x117   :  { %v290_v26 = vadd.f32 1.0, %v1395_v25 }
 0x119   :  { %1396 = vrcp.f32 %v290_v26  ;;  %v181_v26 = vadd.f32 %v1215_v60, %v1612_v16 }
 0x123   :  { %v1397_v27 = vpop.eup %1396 }
 0x124   :  { %v294_v30 = vmul.f32 0.0, %v1397_v27 }
 0x187   :  { %v297_v28 = vpop.permute.xlu0 %296 }
 0x188   :  { %v299_v29 = vmul.f32 %v1397_v27, %v297_v28 }
 0x18a   :  { %301 = vrot.lane.b32.xlu0 %v299_v29, %s1512_s3 }
 0x1fc   :  { %v302_v31 = vpop.permute.xlu0 %301 }
 0x1fd   :  { %v304_v32 = vadd.f32 %v302_v31, %v294_v30 }
 0x1ff   :  { %1398 = vtanh.f32 %v304_v32 }
 0x209   :  { %v1399_v33 = vpop.eup %1398 }
 0x20a   :  { %307 = vrot.lane.b32.xlu1 %v1399_v33, %s1511_s30 }
 0x27c   :  { %v308_v34 = vpop.permute.xlu1 %307 }
 0x27d   :  { %v310_v35 = vmul.f32 %v1397_v27, %v308_v34 }
 0x27f   :  { %314 = vrot.lane.b32.xlu1 %v310_v35, %s1512_s3 }
 0x2f1   :  { %v315_v36 = vpop.permute.xlu1 %314 }
 0x2f2   :  { %1242 = vmatmul.mubr.msk.f32.vlgmr.msra.gmra.mrb[2].mxu1 %vm74_vm1, %v315_v36 }
 0x2f3   :  { %1349 = vmatpush3.bf16.msra.mxu1 %v1587_v9  ;;  %1263 = vmatprep.mubr.msk.f32.mxu1 %vm1509_vm0, %v1510_v1 }
 0x2f4   :  { %1350 = vmatprep.subr.bf16.mxu1 %v1508_v0 }
 0x2f7   :  { %1352 = vmatpush3.bf16.msra.mxu1 %v1591_v14 }
 0x2f8   :  { %1359 = vmatprep.subr.bf16.mxu1 %v1508_v0 }
 0x3c5   :  { %v384_v38 = vpop.f32.mrb[2].mxu1 }
 0x3c6   :  { %v388_v39 = vadd.f32 %v384_v38, %v171_v37  ;;  %v1243_v40 = vpop.f32.mrb[3].mxu1 }
 0x3c8   :  { %1400 = vtanh.f32 %v388_v39  ;;  %v1130_v42 = vmul.f32 -1.442695, %v388_v39 }
 0x3ca   :  { %1402 = vpow2.f32 %v1130_v42 }
 0x3d2   :  { %v1401_v41 = vpop.eup %1400 }
 0x3d3   :  { %398 = vrot.lane.b32.xlu0 %v1401_v41, %s1511_s30 }
 0x3d4   :  { %v1403_v43 = vpop.eup %1402 }
 0x3d5   :  { %v392_v44 = vadd.f32 1.0, %v1403_v43 }
 0x3d7   :  { %1404 = vrcp.f32 %v392_v44  ;;  %v186_v44 = vadd.f32 %v1612_v16, %v1641_v63  ;;  %v191_v63 = vadd.f32 %v1639_v62, %v1612_v16 }
 0x3e1   :  { %v1405_v45 = vpop.eup %1404 }
 0x3e2   :  { %v396_v48 = vmul.f32 %v1405_v45, %v304_v32 }
 0x445   :  { %v399_v46 = vpop.permute.xlu0 %398 }
 0x446   :  { %v401_v47 = vmul.f32 %v1405_v45, %v399_v46 }
 0x448   :  { %403 = vrot.lane.b32.xlu1 %v401_v47, %s1512_s3 }
 0x4ba   :  { %v404_v49 = vpop.permute.xlu1 %403 }
 0x4bb   :  { %v406_v50 = vadd.f32 %v404_v49, %v396_v48 }
 0x4bd   :  { %1406 = vtanh.f32 %v406_v50 }
 0x4c7   :  { %v1407_v57 = vpop.eup %1406 }
 0x4c8   :  { %409 = vrot.lane.b32.xlu0 %v1407_v57, %s1511_s30 }
 0x53a   :  { %v410_v58 = vpop.permute.xlu0 %409 }
 0x53b   :  { %v412_v59 = vmul.f32 %v1405_v45, %v410_v58 }
 0x53d   :  { %416 = vrot.lane.b32.xlu1 %v412_v59, %s1512_s3 }
 0x5af   :  { %v417_v4 = vpop.permute.xlu1 %416 }
 0x5b0   :  { %1253 = vmatmul.mubr.msk.f32.vlgmr.msra.gmra.mrb[8].mxu0 %vm74_vm1, %v417_v4 }
 0x5b1   :  { %1355 = vmatpush3.bf16.msra.mxu0 %v1587_v9  ;;  %1274 = vmatprep.mubr.msk.f32.mxu0 %vm1509_vm0, %v1510_v1 }
 0x5b2   :  { %1356 = vmatprep.subr.bf16.mxu0 %v1508_v0 }
 0x5b5   :  { %1358 = vmatpush3.bf16.msra.mxu0 %v1591_v14 }
 0x5b6   :  { %1365 = vmatprep.subr.bf16.mxu0 %v1508_v0 }
 0x683   :  { %v486_v6 = vpop.f32.mrb[8].mxu0 }
 0x684   :  { %v490_v7 = vadd.f32 %v486_v6, %v176_v5  ;;  %v1254_v8 = vpop.f32.mrb[9].mxu0 }
 0x686   :  { %1408 = vtanh.f32 %v490_v7  ;;  %v1132_v11 = vmul.f32 -1.442695, %v490_v7 }
 0x688   :  { %1410 = vpow2.f32 %v1132_v11 }
 0x690   :  { %v1409_v10 = vpop.eup %1408 }
 0x691   :  { %500 = vrot.lane.b32.xlu0 %v1409_v10, %s1511_s30 }
 0x692   :  { %v1411_v12 = vpop.eup %1410 }
 0x693   :  { %v494_v13 = vadd.f32 1.0, %v1411_v12 }
 0x695   :  { %1412 = vrcp.f32 %v494_v13 }
 0x69f   :  { %v1413_v15 = vpop.eup %1412 }
 0x6a0   :  { %v498_v19 = vmul.f32 %v1413_v15, %v406_v50 }
 0x703   :  { %v501_v17 = vpop.permute.xlu0 %500 }
 0x704   :  { %v503_v18 = vmul.f32 %v1413_v15, %v501_v17 }
 0x706   :  { %505 = vrot.lane.b32.xlu1 %v503_v18, %s1512_s3 }
 0x778   :  { %v506_v20 = vpop.permute.xlu1 %505 }
 0x779   :  { %v508_v21 = vadd.f32 %v506_v20, %v498_v19 }
 0x77b   :  { %1414 = vtanh.f32 %v508_v21 }
 0x785   :  { %v1415_v22 = vpop.eup %1414 }
 0x786   :  { %511 = vrot.lane.b32.xlu0 %v1415_v22, %s1511_s30 }
 0x7f8   :  { %v512_v23 = vpop.permute.xlu0 %511 }
 0x7f9   :  { %v514_v24 = vmul.f32 %v1413_v15, %v512_v23 }
 0x7fb   :  { %518 = vrot.lane.b32.xlu1 %v514_v24, %s1512_s3 }
 0x86d   :  { %v519_v25 = vpop.permute.xlu1 %518 }
 0x86e   :  { %1264 = vmatmul.mubr.msk.f32.vlgmr.msra.gmra.mrb[4].mxu1 %vm74_vm1, %v519_v25 }
 0x86f   :  { %1361 = vmatpush3.bf16.msra.mxu1 %v1587_v9  ;;  %1285 = vmatprep.mubr.msk.f32.mxu1 %vm1509_vm0, %v1510_v1 }
 0x870   :  { %1362 = vmatprep.subr.bf16.mxu1 %v1508_v0 }
 0x873   :  { %1364 = vmatpush3.bf16.msra.mxu1 %v1591_v14 }
 0x874   :  { %1371 = vmatprep.subr.bf16.mxu1 %v1508_v0 }
 0x941   :  { %v588_v27 = vpop.f32.mrb[4].mxu1 }
 0x942   :  { %v592_v28 = vadd.f32 %v588_v27, %v181_v26  ;;  %v1265_v29 = vpop.f32.mrb[5].mxu1 }
 0x944   :  { %1416 = vtanh.f32 %v592_v28  ;;  %v1134_v31 = vmul.f32 -1.442695, %v592_v28 }
 0x946   :  { %1418 = vpow2.f32 %v1134_v31 }
 0x94e   :  { %v1417_v30 = vpop.eup %1416 }
 0x94f   :  { %602 = vrot.lane.b32.xlu0 %v1417_v30, %s1511_s30 }
 0x950   :  { %v1419_v32 = vpop.eup %1418 }
 0x951   :  { %v596_v33 = vadd.f32 1.0, %v1419_v32 }
 0x953   :  { %1420 = vrcp.f32 %v596_v33 }
 0x95d   :  { %v1421_v34 = vpop.eup %1420 }
 0x95e   :  { %v600_v37 = vmul.f32 %v1421_v34, %v508_v21  ;;  %v196_v21 = vadd.f32 %v1612_v16, %v1645_v3 }
 0x9c1   :  { %v603_v35 = vpop.permute.xlu0 %602 }
 0x9c2   :  { %v605_v36 = vmul.f32 %v1421_v34, %v603_v35 }
 0x9c4   :  { %607 = vrot.lane.b32.xlu1 %v605_v36, %s1512_s3 }
 0xa36   :  { %v608_v38 = vpop.permute.xlu1 %607 }
 0xa37   :  { %v610_v39 = vadd.f32 %v608_v38, %v600_v37  ;;  %v201_v37 = vadd.f32 %v1643_v2, %v1612_v16  ;;  %v1025_v2 = vld [vmem:[%s1736_s4] sm:$0xff] }
 0xa39   :  { %1422 = vtanh.f32 %v610_v39 }
 0xa43   :  { %v1423_v40 = vpop.eup %1422 }
 0xa44   :  { %613 = vrot.lane.b32.xlu0 %v1423_v40, %s1511_s30 }
 0xab6   :  { %v614_v41 = vpop.permute.xlu0 %613 }
 0xab7   :  { %v616_v42 = vmul.f32 %v1421_v34, %v614_v41 }
 0xab9   :  { %620 = vrot.lane.b32.xlu1 %v616_v42, %s1512_s3 }
 0xb2b   :  { %v621_v43 = vpop.permute.xlu1 %620 }
 0xb2c   :  { %1275 = vmatmul.mubr.msk.f32.vlgmr.msra.gmra.mrb[10].mxu0 %vm74_vm1, %v621_v43 }
 0xb2d   :  { %1367 = vmatpush3.bf16.msra.mxu0 %v1587_v9  ;;  %1296 = vmatprep.mubr.msk.f32.mxu0 %vm1509_vm0, %v1510_v1 }
 0xb2e   :  { %1368 = vmatprep.subr.bf16.mxu0 %v1508_v0 }
 0xb31   :  { %1370 = vmatpush3.bf16.msra.mxu0 %v1591_v14 }
 0xb32   :  { %1377 = vmatprep.subr.bf16.mxu0 %v1508_v0 }
 0xbff   :  { %v690_v45 = vpop.f32.mrb[10].mxu0 }
 0xc00   :  { %v694_v46 = vadd.f32 %v690_v45, %v186_v44  ;;  %v1276_v47 = vpop.f32.mrb[11].mxu0 }
 0xc02   :  { %1424 = vtanh.f32 %v694_v46  ;;  %v1136_v49 = vmul.f32 -1.442695, %v694_v46 }
 0xc04   :  { %1426 = vpow2.f32 %v1136_v49 }
 0xc0c   :  { %v1425_v48 = vpop.eup %1424 }
 0xc0d   :  { %704 = vrot.lane.b32.xlu0 %v1425_v48, %s1511_s30 }
 0xc0e   :  { %v1427_v50 = vpop.eup %1426 }
 0xc0f   :  { %v698_v51 = vadd.f32 1.0, %v1427_v50  ;;  %v1026_v50 = vld [vmem:[%s1736_s4 + $0x8] sm:$0xff] }
 0xc11   :  { %1428 = vrcp.f32 %v698_v51  ;;  %v1027_v51 = vld [vmem:[%s1736_s4 + $0x10] sm:$0xff] }
 0xc1b   :  { %v1429_v52 = vpop.eup %1428 }
 0xc1c   :  { %v702_v55 = vmul.f32 %v1429_v52, %v610_v39 }
 0xc7f   :  { %v705_v53 = vpop.permute.xlu0 %704 }
 0xc80   :  { %v707_v54 = vmul.f32 %v1429_v52, %v705_v53  ;;  %v1028_v53 = vld [vmem:[%s1736_s4 + $0x18] sm:$0xff] }
 0xc82   :  { %709 = vrot.lane.b32.xlu1 %v707_v54, %s1512_s3  ;;  %v1381_v54 = vpack.c.bf16 %v1028_v53, %v1027_v51 }
 0xcf4   :  { %v710_v56 = vpop.permute.xlu1 %709 }
 0xcf5   :  { %v712_v57 = vadd.f32 %v710_v56, %v702_v55 }
 0xcf7   :  { %1430 = vtanh.f32 %v712_v57 }
 0xd01   :  { %v1431_v58 = vpop.eup %1430 }
 0xd02   :  { %715 = vrot.lane.b32.xlu0 %v1431_v58, %s1511_s30 }
 0xd74   :  { %v716_v59 = vpop.permute.xlu0 %715 }
 0xd75   :  { %v718_v60 = vmul.f32 %v1429_v52, %v716_v59  ;;  %v1378_v52 = vpack.c.bf16 %v1026_v50, %v1025_v2  ;;  %v1143_v59 = vld [vmem:[%s1737_s5] ss:$0 sm:$0xff] }
 0xd77   :  { %722 = vrot.lane.b32.xlu1 %v718_v60, %s1512_s3 }
 0xde9   :  { %v723_v61 = vpop.permute.xlu1 %722 }
 0xdea   :  { %1286 = vmatmul.mubr.msk.f32.vlgmr.msra.gmra.mrb[6].mxu1 %vm74_vm1, %v723_v61 }
 0xdeb   :  { %1373 = vmatpush3.bf16.msra.mxu1 %v1587_v9  ;;  %1307 = vmatprep.mubr.msk.f32.mxu1 %vm1509_vm0, %v1510_v1 }
 0xdec   :  { %1374 = vmatprep.subr.bf16.mxu1 %v1508_v0 }
 0xdef   :  { %1376 = vmatpush3.bf16.msra.mxu1 %v1591_v14 }
 0xebd   :  { %v792_v4 = vpop.f32.mrb[6].mxu1 }
 0xebe   :  { %v796_v5 = vadd.f32 %v792_v4, %v191_v63  ;;  %v1287_v6 = vpop.f32.mrb[7].mxu1 }
 0xec0   :  { %1432 = vtanh.f32 %v796_v5  ;;  %v1138_v8 = vmul.f32 -1.442695, %v796_v5 }
 0xec2   :  { %1434 = vpow2.f32 %v1138_v8 }
 0xeca   :  { %v1433_v7 = vpop.eup %1432 }
 0xecb   :  { %806 = vrot.lane.b32.xlu0 %v1433_v7, %s1511_s30 }
 0xecc   :  { %v1435_v9 = vpop.eup %1434 }
 0xecd   :  { %v800_v10 = vadd.f32 1.0, %v1435_v9 }
 0xecf   :  { %1436 = vrcp.f32 %v800_v10 }
 0xed9   :  { %v1437_v11 = vpop.eup %1436 }
 0xeda   :  { %v804_v14 = vmul.f32 %v1437_v11, %v712_v57 }
 0xf3d   :  { %v807_v12 = vpop.permute.xlu0 %806 }
 0xf3e   :  { %v809_v13 = vmul.f32 %v1437_v11, %v807_v12 }
 0xf40   :  { %811 = vrot.lane.b32.xlu1 %v809_v13, %s1512_s3 }
 0xfb2   :  { %v812_v15 = vpop.permute.xlu1 %811 }
 0xfb3   :  { %v814_v62 = vadd.f32 %v812_v15, %v804_v14 }
 0xfb5   :  { %1438 = vtanh.f32 %v814_v62 }
 0xfbf   :  { %v1439_v17 = vpop.eup %1438 }
 0xfc0   :  { %817 = vrot.lane.b32.xlu0 %v1439_v17, %s1511_s30 }
0x1032   :  { %v818_v18 = vpop.permute.xlu0 %817 }
0x1033   :  { %v820_v19 = vmul.f32 %v1437_v11, %v818_v18 }
0x1035   :  { %824 = vrot.lane.b32.xlu1 %v820_v19, %s1512_s3 }
0x10a7   :  { %v825_v20 = vpop.permute.xlu1 %824 }
0x10a8   :  { %1297 = vmatmul.mubr.msk.f32.vlgmr.msra.gmra.mrb[12].mxu0 %vm74_vm1, %v825_v20 }
0x10a9   :  { %1318 = vmatprep.mubr.msk.f32.mxu0 %vm1509_vm0, %v1510_v1  ;;  %1379 = vmatpush3.bf16.msra.mxu0 %v1378_v52 }
0x10aa   :  { %1380 = vmatprep.subr.bf16.mxu0 %v1508_v0 }
0x10ad   :  { %1382 = vmatpush3.bf16.msra.mxu0 %v1381_v54 }
0x117b   :  { %v894_v22 = vpop.f32.mrb[12].mxu0 }
0x117c   :  { %v898_v23 = vadd.f32 %v894_v22, %v196_v21  ;;  %v1298_v24 = vpop.f32.mrb[13].mxu0 }
0x117e   :  { %1440 = vtanh.f32 %v898_v23  ;;  %v1140_v26 = vmul.f32 -1.442695, %v898_v23 }
0x1180   :  { %1442 = vpow2.f32 %v1140_v26 }
0x1188   :  { %v1441_v25 = vpop.eup %1440 }
0x1189   :  { %908 = vrot.lane.b32.xlu0 %v1441_v25, %s1511_s30 }
0x118a   :  { %v1443_v27 = vpop.eup %1442 }
0x118b   :  { %v902_v28 = vadd.f32 1.0, %v1443_v27 }
0x118d   :  { %1444 = vrcp.f32 %v902_v28 }
0x1197   :  { %v1445_v29 = vpop.eup %1444 }
0x1198   :  { %v906_v1 = vmul.f32 %v1445_v29, %v814_v62 }
0x11fb   :  { %v909_v30 = vpop.permute.xlu0 %908 }
0x11fc   :  { %v911_v31 = vmul.f32 %v1445_v29, %v909_v30 }
0x11fe   :  { %913 = vrot.lane.b32.xlu1 %v911_v31, %s1512_s3 }
0x1270   :  { %v914_v32 = vpop.permute.xlu1 %913 }
0x1271   :  { %v916_v3 = vadd.f32 %v914_v32, %v906_v1 }
0x1273   :  { %1446 = vtanh.f32 %v916_v3 }
0x127d   :  { %v1447_v33 = vpop.eup %1446 }
0x127e   :  { %919 = vrot.lane.b32.xlu0 %v1447_v33, %s1511_s30 }
0x12f0   :  { %v920_v34 = vpop.permute.xlu0 %919 }
0x12f1   :  { %v922_v35 = vmul.f32 %v1445_v29, %v920_v34 }
0x12f3   :  { %926 = vrot.lane.b32.xlu1 %v922_v35, %s1512_s3 }
0x1365   :  { %v927_v36 = vpop.permute.xlu1 %926 }
0x1366   :  { %1308 = vmatmul.mubr.msk.f32.vlgmr.msra.gmra.mrb[8].mxu1 %vm74_vm1, %v927_v36 }
0x1439   :  { %v996_v38 = vpop.f32.mrb[8].mxu1 }
0x143a   :  { %v1000_v39 = vadd.f32 %v996_v38, %v201_v37  ;;  %v1309_v40 = vpop.f32.mrb[9].mxu1 }
0x143c   :  { %1448 = vtanh.f32 %v1000_v39  ;;  %v1142_v42 = vmul.f32 -1.442695, %v1000_v39 }
0x143e   :  { %1450 = vpow2.f32 %v1142_v42 }
0x1446   :  { %v1449_v41 = vpop.eup %1448 }
0x1447   :  { %1010 = vrot.lane.b32.xlu0 %v1449_v41, %s1511_s30 }
0x1448   :  { %v1451_v43 = vpop.eup %1450 }
0x1449   :  { %v1004_v44 = vadd.f32 1.0, %v1451_v43 }
0x144b   :  { %1452 = vrcp.f32 %v1004_v44 }
0x1455   :  { %v1453_v45 = vpop.eup %1452 }
0x1456   :  { %v1008_v48 = vmul.f32 %v1453_v45, %v916_v3 }
0x14b9   :  { %v1011_v46 = vpop.permute.xlu0 %1010 }
0x14ba   :  { %v1013_v47 = vmul.f32 %v1453_v45, %v1011_v46 }
0x14bc   :  { %1015 = vrot.lane.b32.xlu1 %v1013_v47, %s1512_s3 }
0x152e   :  { %v1016_v49 = vpop.permute.xlu1 %1015 }
0x152f   :  { %v1018_v16 = vadd.f32 %v1016_v49, %v1008_v48 }
0x1531   :  { %1454 = vtanh.f32 %v1018_v16 }
0x153b   :  { %v1455_v55 = vpop.eup %1454 }
0x153c   :  { %1021 = vrot.lane.b32.xlu0 %v1455_v55, %s1511_s30 }
0x15ae   :  { %v1022_v56 = vpop.permute.xlu0 %1021 }
0x15af   :  { %v1024_v57 = vmul.f32 %v1453_v45, %v1022_v56 }
0x15b1   :  { %1037 = vrot.lane.b32.xlu1 %v1024_v57, %s1512_s3 }
0x1623   :  { %v1038_v58 = vpop.permute.xlu1 %1037 }
0x1624   :  { %1319 = vmatmul.mubr.msk.f32.vlgmr.msra.gmra.mrb[14].mxu0 %vm74_vm1, %v1038_v58 }
0x16f7   :  { %v1107_v60 = vpop.f32.mrb[14].mxu0 }
0x16f8   :  { %v1108_v61 = vadd.f32 %v1143_v59, %v1107_v60  ;;  %v1320_v63 = vpop.f32.mrb[15].mxu0 }
0x16fa   :  { %1112 = vst.msk [vmem:[%s1738_s6] sm:$0xff] %vm1111_vm2, %v1108_v61 }
0x16fb   :  { %1117 = vsyncpa [#allocation4], 1 }
0x16fc   :  { %1118 = vsyncpa [#allocation6], 1 }

</bundles_post_ra>
